<compile_context>
chip_gen: v5e
topology: v5e:2x2
jax: 0.10.0
libtpu: 0.0.40
codegen_flags: <defaults>
</compile_context>

<pallas_src>
import jax
import jax.numpy as jnp
from jax.experimental import pallas as pl
from jax.experimental.pallas import tpu as pltpu

BN_EPS = 1e-5
LANES = 128
VMEM_LIMIT = 32 * 1024 * 1024  # leaves headroom inside v7x's 64 MiB physical VMEM


# ------------------------------- small utils --------------------------------

def _pad_to(c, m=LANES):
    return ((c + m - 1) // m) * m


def _pad_lanes(x, cp):
    c = x.shape[-1]
    if c == cp:
        return x
    return jnp.pad(x, [(0, 0)] * (x.ndim - 1) + [(0, cp - c)])


def _row_tile(p, target=512):
    t = min(p, target)
    while t > 1 and p % t:
        t -= 1
    return max(t, 1)


def _pick_row_tile_h(h, w, target_rows=1024):
    th = 1
    for cand in range(1, h + 1):
        if h % cand == 0 and cand * w <= target_rows:
            th = cand
    return th


def _cparams():
    return pltpu.CompilerParams(dimension_semantics=("parallel",),
                                vmem_limit_bytes=VMEM_LIMIT)


# ------------------------------ Pallas kernels -------------------------------

def _matmul_bias_kernel(x_ref, w_ref, b_ref, o_ref):
    # x: (Tp, K) bf16, w: (K, M) bf16 resident, b: (1, M) f32 resident
    acc = jnp.dot(x_ref[...], w_ref[...], preferred_element_type=jnp.float32)
    o_ref[...] = (acc + b_ref[...]).astype(o_ref.dtype)


def _conv3x3_stats_kernel(x_ref, w_ref, o_ref, stats_ref):
    # x: (Th+2, W+2, Cin) bf16 halo tile; w: (9, Cin, Cout) bf16 resident
    # o: (Th*W, Cout) f32 conv output; stats: (2, Cout) f32 (sum, sum of squares)
    th = x_ref.shape[0] - 2
    w_sp = x_ref.shape[1] - 2
    cin = x_ref.shape[2]
    cout = w_ref.shape[2]
    xt = x_ref[...]
    acc = jnp.zeros((th * w_sp, cout), jnp.float32)
    for kh in range(3):
        for kw in range(3):
            view = xt[kh:kh + th, kw:kw + w_sp, :].reshape(th * w_sp, cin)
            acc += jnp.dot(view, w_ref[kh * 3 + kw],
                           preferred_element_type=jnp.float32)
    o_ref[...] = acc
    stats_ref[...] = jnp.concatenate(
        [jnp.sum(acc, axis=0, keepdims=True),
         jnp.sum(acc * acc, axis=0, keepdims=True)], axis=0)


def _bn_relu_kernel(x_ref, scale_ref, shift_ref, o_ref):
    # Folded BN (scale = gamma*rsqrt(var+eps), shift = beta - mean*scale) + ReLU.
    y = x_ref[...] * scale_ref[...] + shift_ref[...]
    o_ref[...] = jnp.maximum(y, 0.0).astype(o_ref.dtype)


# ------------------------------ kernel wrappers ------------------------------

def matmul_bias(x2d, w, b, out_dtype=jnp.float32):
    """Row-tiled (P, K) @ (K, M) + bias with resident weights."""
    p, k = x2d.shape
    m = w.shape[1]
    tp = _row_tile(p)
    return pl.pallas_call(
        _matmul_bias_kernel,
        out_shape=jax.ShapeDtypeStruct((p, m), out_dtype),
        grid=(p // tp,),
        in_specs=[pl.BlockSpec((tp, k), lambda i: (i, 0)),
                  pl.BlockSpec((k, m), lambda i: (0, 0)),
                  pl.BlockSpec((1, m), lambda i: (0, 0))],
        out_specs=pl.BlockSpec((tp, m), lambda i: (i, 0)),
        compiler_params=_cparams(),
    )(x2d, w, b)


def conv3x3_matmul_stats(x_nhwc, w9, th):
    """3x3 conv (pad=1) over halo row-tiles; returns flat conv out + tile stats."""
    n, h, w, cin = x_nhwc.shape
    cout = w9.shape[-1]
    nht = h // th
    nt = n * nht
    xp = jnp.pad(x_nhwc, ((0, 0), (1, 1), (1, 1), (0, 0)))
    # Overlapping H tiles with 1-row halos (cheap, replaces the 9x im2col slab).
    halo = jnp.stack([xp[:, i * th:i * th + th + 2] for i in range(nht)], axis=1)
    halo = halo.reshape(nt, th + 2, w + 2, cin)

    out, stats = pl.pallas_call(
        _conv3x3_stats_kernel,
        out_shape=(jax.ShapeDtypeStruct((n * h * w, cout), jnp.float32),
                   jax.ShapeDtypeStruct((nt, 2, cout), jnp.float32)),
        grid=(nt,),
        in_specs=[pl.BlockSpec((None, th + 2, w + 2, cin),
                               lambda t: (t, 0, 0, 0)),
                  pl.BlockSpec((9, cin, cout), lambda t: (0, 0, 0))],
        out_specs=(pl.BlockSpec((th * w, cout), lambda t: (t, 0)),
                   pl.BlockSpec((None, 2, cout), lambda t: (t, 0, 0))),
        compiler_params=_cparams(),
    )(halo, w9)
    return out, stats


def bn_relu_apply(x2d, scale, shift, out_dtype):
    p, c = x2d.shape
    tp = _row_tile(p)
    return pl.pallas_call(
        _bn_relu_kernel,
        out_shape=jax.ShapeDtypeStruct((p, c), out_dtype),
        grid=(p // tp,),
        in_specs=[pl.BlockSpec((tp, c), lambda i: (i, 0)),
                  pl.BlockSpec((1, c), lambda i: (0, 0)),
                  pl.BlockSpec((1, c), lambda i: (0, 0))],
        out_specs=pl.BlockSpec((tp, c), lambda i: (i, 0)),
        compiler_params=_cparams(),
    )(x2d, scale, shift)


def conv3x3_bn_relu(x_nhwc, w9, gamma_p, beta_p, out_dtype):
    """Conv3x3 (no bias) + train-mode BatchNorm (global batch stats) + ReLU."""
    n, h, w, _ = x_nhwc.shape
    th = _pick_row_tile_h(h, w)
    conv_flat, stats = conv3x3_matmul_stats(x_nhwc, w9, th)
    count = jnp.float32(n * h * w)
    total = jnp.sum(stats, axis=0)                        # (2, Cout)
    mean = total[0] / count
    var = jnp.maximum(total[1] / count - mean * mean, 0.0)  # biased variance
    scale = gamma_p * jax.lax.rsqrt(var + BN_EPS)
    shift = beta_p - mean * scale
    return bn_relu_apply(conv_flat, scale[None, :], shift[None, :], out_dtype)


def upconv2x2(x_nchw, w_pt, b, cout_pad):
    """ConvTranspose2d(k=2, s=2): out[n,2i+a,2j+b,co] = x[n,i,j,:]·W[:,co,a,b]+bias."""
    n, cin, hin, win = x_nchw.shape
    cout = w_pt.shape[1]
    cin_pad = _pad_to(cin)
    x2d = jnp.transpose(x_nchw, (0, 2, 3, 1)).reshape(n * hin * win, cin)
    x2d = _pad_lanes(x2d, cin_pad).astype(jnp.bfloat16)
    wt = jnp.transpose(w_pt, (0, 2, 3, 1))                # (Cin, 2, 2, Cout)
    wt = jnp.pad(wt, ((0, cin_pad - cin), (0, 0), (0, 0), (0, cout_pad - cout)))
    wt = wt.reshape(cin_pad, 4 * cout_pad).astype(jnp.bfloat16)
    bp = jnp.tile(_pad_lanes(b.astype(jnp.float32)[None, :], cout_pad), (1, 4))
    out = matmul_bias(x2d, wt, bp, out_dtype=jnp.float32)  # (P, 4*cout_pad)
    out = out.reshape(n, hin, win, 2, 2, cout_pad)
    out = jnp.transpose(out, (0, 1, 3, 2, 4, 5)).reshape(n, 2 * hin, 2 * win, cout_pad)
    return out[..., :cout]


def _prep_conv3x3_weight(w_pt, cin_pad, cout_pad):
    # (Cout, Cin, 3, 3) -> (3, 3, Cin, Cout) -> pad channels -> (9, Cin_p, Cout_p)
    wt = jnp.transpose(w_pt, (2, 3, 1, 0))
    wt = jnp.pad(wt, ((0, 0), (0, 0), (0, cin_pad - wt.shape[2]),
                      (0, cout_pad - wt.shape[3])))
    return wt.reshape(9, cin_pad, cout_pad).astype(jnp.bfloat16)


# ------------------------------- forward pass --------------------------------

def init_upconv2d_block_params(key, in_channels, res_channels=0,
                               last_layer=False, num_classes=None):
    mid = in_channels // 2
    ks = jax.random.split(key, 8)

    def uinit(k, shape, fan_in):
        bound = 1.0 / jnp.sqrt(jnp.float32(fan_in))
        return jax.random.uniform(k, shape, jnp.float32, -bound, bound)

    # conv1/conv2 biases intentionally omitted: train-mode BatchNorm subtracts
    # the batch mean, which cancels a per-channel bias exactly.
    params = dict(
        w_up=uinit(ks[0], (in_channels, in_channels, 2, 2), in_channels * 4),
        b_up=uinit(ks[1], (in_channels,), in_channels * 4),
        w1=uinit(ks[2], (mid, in_channels + res_channels, 3, 3),
                 (in_channels + res_channels) * 9),
        w2=uinit(ks[3], (mid, mid, 3, 3), mid * 9),
        gamma=1.0 + 0.1 * jax.random.normal(ks[4], (mid,), jnp.float32),
        beta=0.1 * jax.random.normal(ks[5], (mid,), jnp.float32),
    )
    if last_layer:
        params["w3"] = uinit(ks[6], (num_classes, mid, 1, 1), mid)
        params["b3"] = uinit(ks[7], (num_classes,), mid)
    return params


def upconv2d_block_forward(params, x_nchw, residual_nchw=None):
    """Equivalent of UpConv2DBlock.forward (training-mode BN); NCHW in/out."""
    in_ch = params["w_up"].shape[0]
    mid = in_ch // 2
    mid_pad = _pad_to(mid)

    # 1) ConvTranspose2d(2,2,stride=2) + bias (bias kept: conv1's zero padding
    #    breaks its spatial uniformity, so BN does not cancel it exactly).
    up = upconv2x2(x_nchw, params["w_up"], params["b_up"], _pad_to(in_ch))

    # 2) concat skip connection along channels (real channels, NHWC).
    if residual_nchw is not None:
        res = jnp.transpose(residual_nchw, (0, 2, 3, 1)).astype(up.dtype)
        feat = jnp.concatenate([up, res], axis=-1)
    else:
        feat = up
    n, h, w, cin1 = feat.shape
    cin1_pad = _pad_to(cin1)
    feat = _pad_lanes(feat, cin1_pad).astype(jnp.bfloat16)

    gamma_p = _pad_lanes(params["gamma"].astype(jnp.float32)[None, :], mid_pad)[0]
    beta_p = _pad_lanes(params["beta"].astype(jnp.float32)[None, :], mid_pad)[0]

    # 3) conv1 + BN + ReLU  (same BN affine params reused for both convs, as in
    #    the PyTorch module; batch stats recomputed per application).
    w1 = _prep_conv3x3_weight(params["w1"], cin1_pad, mid_pad)
    y1 = conv3x3_bn_relu(feat, w1, gamma_p, beta_p, jnp.bfloat16)
    y1 = y1.reshape(n, h, w, mid_pad)

    # 4) conv2 + BN + ReLU
    w2 = _prep_conv3x3_weight(params["w2"], mid_pad, mid_pad)
    y2 = conv3x3_bn_relu(y1, w2, gamma_p, beta_p, jnp.float32)  # (n*h*w, mid_pad)

    # TODO(synk): nn.BatchNorm2d running_mean/var buffer updates (training-mode
    # side effect) are not modeled; the forward output is unaffected.

    if "w3" in params:  # last_layer: 1x1 conv head = channel matmul
        nc = params["w3"].shape[0]
        nc_pad = _pad_to(nc)
        w3 = jnp.transpose(params["w3"].reshape(nc, mid), (1, 0))
        w3 = jnp.pad(w3, ((0, mid_pad - mid), (0, nc_pad - nc))).astype(jnp.bfloat16)
        b3 = _pad_lanes(params["b3"].astype(jnp.float32)[None, :], nc_pad)
        y3 = matmul_bias(y2.astype(jnp.bfloat16), w3, b3, out_dtype=jnp.float32)
        out = y3.reshape(n, h, w, nc_pad)[..., :nc]
    else:
        out = y2.reshape(n, h, w, mid_pad)[..., :mid]
    return jnp.transpose(out, (0, 3, 1, 2))  # NHWC -> NCHW


if __name__ == "__main__":
    key = jax.random.PRNGKey(0)
    k_x, k_r, k_p, k_p2 = jax.random.split(key, 4)

    in_channels, res_channels = 8, 8
    N, Hin, Win = 2, 8, 8
    x = jax.random.normal(k_x, (N, in_channels, Hin, Win), jnp.float32)       # NCHW
    residual = jax.random.normal(k_r, (N, res_channels, 2 * Hin, 2 * Win),
                                 jnp.float32)

    params = init_upconv2d_block_params(k_p, in_channels, res_channels)
    out = jax.block_until_ready(upconv2d_block_forward(params, x, residual))
    assert out.shape == (N, in_channels // 2, 2 * Hin, 2 * Win), out.shape
    assert bool(jnp.all(jnp.isfinite(out)))

    # last-layer variant exercises the 1x1 conv3 head
    params_ll = init_upconv2d_block_params(k_p2, in_channels, res_channels,
                                           last_layer=True, num_classes=3)
    out_ll = jax.block_until_ready(upconv2d_block_forward(params_ll, x, residual))
    assert out_ll.shape == (N, 3, 2 * Hin, 2 * Win), out_ll.shape

    print("KERNEL_OK")
</pallas_src>

<mosaic_0001>
module attributes {stable_mosaic.version = 11 : i64} {
  func.func @_matmul_bias_kernel(%arg0: i32, %arg1: memref<128x128xbf16, #tpu.memory_space<vmem>>, %arg2: memref<128x512xbf16, #tpu.memory_space<vmem>>, %arg3: memref<1x512xf32, #tpu.memory_space<vmem>>, %arg4: memref<128x512xf32, #tpu.memory_space<vmem>>) attributes {dimension_semantics = [#tpu.dimension_semantics<parallel>], iteration_bounds = array<i64: 1>, scalar_prefetch = 0 : i64, scratch_operands = 0 : i64, tpu.core_type = #tpu.core_type<tc>, window_params = [{transform_indices = @transform_0, window_bounds = array<i64: 128, 128>}, {pipeline_mode = #tpu.pipeline_mode<synchronous>, transform_indices = @transform_1, window_bounds = array<i64: 128, 512>}, {pipeline_mode = #tpu.pipeline_mode<synchronous>, transform_indices = @transform_2, window_bounds = array<i64: 1, 512>}, {transform_indices = @transform_3, window_bounds = array<i64: 128, 512>}]} {
    %c0 = arith.constant 0 : index
    %c0_0 = arith.constant 0 : index
    %0 = vector.load %arg1[%c0, %c0_0] : memref<128x128xbf16, #tpu.memory_space<vmem>>, vector<128x128xbf16>
    %c0_1 = arith.constant 0 : index
    %c0_2 = arith.constant 0 : index
    %1 = vector.load %arg2[%c0_1, %c0_2] : memref<128x512xbf16, #tpu.memory_space<vmem>>, vector<128x512xbf16>
    %cst = arith.constant dense<0.000000e+00> : vector<128x512xf32>
    %2 = tpu.matmul %0, %1, %cst {dimension_numbers = #tpu.dot_dimension_numbers<[1], [0], [0], [1], [0, 0, 1, 1], [], []>} : vector<128x128xbf16>, vector<128x512xbf16>, vector<128x512xf32> -> vector<128x512xf32>
    %c0_3 = arith.constant 0 : index
    %c0_4 = arith.constant 0 : index
    %3 = vector.load %arg3[%c0_3, %c0_4] : memref<1x512xf32, #tpu.memory_space<vmem>>, vector<1x512xf32>
    %4 = vector.broadcast %3 : vector<1x512xf32> to vector<128x512xf32>
    %5 = arith.addf %2, %4 : vector<128x512xf32>
    %c0_5 = arith.constant 0 : index
    %c0_6 = arith.constant 0 : index
    %6 = vector.load %arg4[%c0_5, %c0_6] : memref<128x512xf32, #tpu.memory_space<vmem>>, vector<128x512xf32>
    tpu.vector_store %arg4[%c0_5, %c0_6], %5 {strides = array<i32>} : memref<128x512xf32, #tpu.memory_space<vmem>>, vector<128x512xf32>,
    return
  }
  func.func @transform_0(%arg0: i32) -> (i32, i32) {
    %c0_i32 = arith.constant 0 : i32
    %c0_i32_0 = arith.constant 0 : i32
    return %arg0, %c0_i32 : i32, i32
  }
  func.func @transform_1(%arg0: i32) -> (i32, i32) {
    %c0_i32 = arith.constant 0 : i32
    %c0_i32_0 = arith.constant 0 : i32
    %c0_i32_1 = arith.constant 0 : i32
    return %c0_i32, %c0_i32_0 : i32, i32
  }
  func.func @transform_2(%arg0: i32) -> (i32, i32) {
    %c0_i32 = arith.constant 0 : i32
    %c0_i32_0 = arith.constant 0 : i32
    %c0_i32_1 = arith.constant 0 : i32
    return %c0_i32, %c0_i32_0 : i32, i32
  }
  func.func @transform_3(%arg0: i32) -> (i32, i32) {
    %c0_i32 = arith.constant 0 : i32
    %c0_i32_0 = arith.constant 0 : i32
    return %arg0, %c0_i32 : i32, i32
  }
}

</mosaic_0001>

<bundles_post_ra>
// kernel: tpu_custom_call.1
= control target key start
LH: loop header
LB: loop body
LE: loop exit
PB: predicated region body
PF: predicated region fallthrough
CT: control target
= control target key end

     0   :  { %8 = vsyncpa [#allocation3], 0  ;;  %s1032_s0 = inlined_call_operand.hbm [shape: bf16[128,128], index: 0, kind: input, shape index: {}]   ;;  %s1033_s1 = inlined_call_operand.hbm [shape: bf16[128,512], index: 1, kind: input, shape index: {}]   ;;  %s1034_s2 = inlined_call_operand.hbm [shape: f32[1,512], index: 2, kind: input, shape index: {}]   ;;  %s1035_s3 = inlined_call_operand.hbm [shape: f32[128,512], index: 3, kind: output, shape index: {}]  }
   0x1   :  { %9 = vsyncpa [#allocation6], 0  ;;  %s28_s14 = sshll.u32 %s1033_s1, 4  ;;  %s29_s14 = int_to_ptr.hbm [resolvable:$true] %s28_s14 }
   0x2   :  { %10 = vsyncpa [#allocation4], 0  ;;  %s918_s15 = smov [#allocation5]   ;;  %s15_s19 = sshll.u32 %s1032_s0, 4  ;;  %s16_s19 = int_to_ptr.hbm [resolvable:$true] %s15_s19 }
   0x3   :  { %s30_s16 = sshll.u32 %s918_s15, 4  ;;  %s919_s20 = smov 256   ;;  %s31_s16 = int_to_ptr.vmem [resolvable:$true] %s30_s16 }
   0x4   :  { %s920_s21 = smov 16   ;;  %s921_s22 = smov [#allocation2]  }
   0x5   :  { %36 = dma.hbm_to_vmem [thread:$0]  %s29_s14, 4096, %s31_s16, [#allocation6], %s919_s20, %s919_s20, %s920_s21  }
   0x6   :  { %s17_s23 = sshll.u32 %s921_s22, 4  ;;  %s922_s24 = smov 64   ;;  %s18_s23 = int_to_ptr.vmem [resolvable:$true] %s17_s23 }
   0x7   :  { %s923_s25 = smov 4   ;;  %s42_s27 = sshll.u32 %s1034_s2, 4  ;;  %s43_s27 = int_to_ptr.hbm [resolvable:$true] %s42_s27 }
   0x8   :  { %23 = dma.hbm_to_vmem [thread:$0]  %s16_s19, 1024, %s18_s23, [#allocation3], %s922_s24, %s922_s24, %s923_s25  }
   0x9   :  { %s924_s28 = smov [#allocation7]  }
   0xa   :  { %s44_s29 = sshll.u32 %s924_s28, 4  ;;  %s45_s29 = int_to_ptr.vmem [resolvable:$true] %s44_s29 }
   0xb   :  { %47 = dma.hbm_to_vmem [thread:$0]  %s43_s27, 64, %s45_s29, [#allocation6]  }
   0xc   :  { %912 = dma.done.wait [#allocation3], 1024  }
   0xd   :  { %913 = vsyncadd [#allocation3], 4294966272 }
   0xe   :  { %914 = dma.done.wait [#allocation6], 4160  }
   0xf   :  { %915 = vsyncadd [#allocation6], 4294963136  ;;  %v752_v0 = vld [vmem:[#allocation5 + $0xe0] sm:$0xf]  ;;  %v804_v1 = vld [vmem:[#allocation5 + $0xec] sm:$0xf0] }
  0x10   :  { %v802_v2 = vld [vmem:[#allocation5 + $0xe4] sm:$0xf]  ;;  %v753_v3 = vor.u32 %v804_v1, %v752_v0  ;;  %v754_v4 = vld [vmem:[#allocation5 + $0xf0] sm:$0xf0]  ;;  %v760_v5 = vld [vmem:[#allocation5 + $0xe8] sm:$0xf] }
  0x11   :  { %v805_v6 = vld [vmem:[#allocation5 + $0xf4] sm:$0xf0]  ;;  %v757_v7 = vor.u32 %v802_v2, %v754_v4  ;;  %v803_v9 = vld [vmem:[#allocation5 + $0xec] sm:$0xf]  ;;  %v762_v10 = vld [vmem:[#allocation5 + $0xf8] sm:$0xf0] }
  0x12   :  { %v761_v8 = vor.u32 %v805_v6, %v760_v5  ;;  %v736_v11 = vld [vmem:[#allocation5 + $0xc0] sm:$0xf]  ;;  %326 = vmatpush.bf16.msra.mxu0 %v753_v3  ;;  %v765_v12 = vor.u32 %v803_v9, %v762_v10  ;;  %v800_v13 = vld [vmem:[#allocation5 + $0xcc] sm:$0xf0]  ;;  %v798_v14 = vld [vmem:[#allocation5 + $0xc4] sm:$0xf] }
  0x13   :  { %v738_v15 = vld [vmem:[#allocation5 + $0xd0] sm:$0xf0]  ;;  %375 = vmatpush.bf16.msra.mxu1 %v757_v7  ;;  %v737_v16 = vor.u32 %v800_v13, %v736_v11  ;;  %v744_v18 = vld [vmem:[#allocation5 + $0xc8] sm:$0xf]  ;;  %v801_v19 = vld [vmem:[#allocation5 + $0xd4] sm:$0xf0] }
  0x14   :  { %424 = vmatpush.bf16.msra.mxu2 %v761_v8  ;;  %v741_v17 = vor.u32 %v798_v14, %v738_v15  ;;  %v799_v20 = vld [vmem:[#allocation5 + $0xcc] sm:$0xf]  ;;  %473 = vmatpush.bf16.msra.mxu3 %v765_v12  ;;  %v745_v21 = vor.u32 %v801_v19, %v744_v18  ;;  %v746_v22 = vld [vmem:[#allocation5 + $0xd8] sm:$0xf0]  ;;  %v720_v23 = vld [vmem:[#allocation5 + $0xa0] sm:$0xf] }
  0x15   :  { %v796_v24 = vld [vmem:[#allocation5 + $0xac] sm:$0xf0]  ;;  %v749_v25 = vor.u32 %v799_v20, %v746_v22  ;;  %v794_v26 = vld [vmem:[#allocation5 + $0xa4] sm:$0xf]  ;;  %v722_v27 = vld [vmem:[#allocation5 + $0xb0] sm:$0xf0] }
  0x16   :  { %v728_v28 = vld [vmem:[#allocation5 + $0xa8] sm:$0xf]  ;;  %327 = vmatpush.bf16.msra.mxu0 %v737_v16  ;;  %v721_v29 = vor.u32 %v796_v24, %v720_v23  ;;  %v797_v30 = vld [vmem:[#allocation5 + $0xb4] sm:$0xf0]  ;;  %v795_v31 = vld [vmem:[#allocation5 + $0xac] sm:$0xf]  ;;  %v725_v33 = vor.u32 %v794_v26, %v722_v27 }
  0x17   :  { %v730_v32 = vld [vmem:[#allocation5 + $0xb8] sm:$0xf0]  ;;  %376 = vmatpush.bf16.msra.mxu1 %v741_v17  ;;  %v729_v34 = vor.u32 %v797_v30, %v728_v28  ;;  %v704_v35 = vld [vmem:[#allocation5 + $0x80] sm:$0xf]  ;;  %v792_v36 = vld [vmem:[#allocation5 + $0x8c] sm:$0xf0] }
  0x18   :  { %425 = vmatpush.bf16.msra.mxu2 %v745_v21  ;;  %v790_v37 = vld [vmem:[#allocation5 + $0x84] sm:$0xf]  ;;  %474 = vmatpush.bf16.msra.mxu3 %v749_v25  ;;  %v733_v38 = vor.u32 %v795_v31, %v730_v32  ;;  %v706_v39 = vld [vmem:[#allocation5 + $0x90] sm:$0xf0]  ;;  %v712_v40 = vld [vmem:[#allocation5 + $0x88] sm:$0xf]  ;;  %v705_v44 = vor.u32 %v792_v36, %v704_v35 }
  0x19   :  { %v793_v41 = vld [vmem:[#allocation5 + $0x94] sm:$0xf0]  ;;  %v791_v42 = vld [vmem:[#allocation5 + $0x8c] sm:$0xf]  ;;  %v714_v43 = vld [vmem:[#allocation5 + $0x98] sm:$0xf0]  ;;  %v709_v45 = vor.u32 %v790_v37, %v706_v39 }
  0x1a   :  { %328 = vmatpush.bf16.msra.mxu0 %v721_v29  ;;  %v713_v46 = vor.u32 %v793_v41, %v712_v40  ;;  %v688_v47 = vld [vmem:[#allocation5 + $0x60] sm:$0xf]  ;;  %v788_v48 = vld [vmem:[#allocation5 + $0x6c] sm:$0xf0]  ;;  %v786_v49 = vld [vmem:[#allocation5 + $0x64] sm:$0xf]  ;;  %v717_v50 = vor.u32 %v791_v42, %v714_v43 }
  0x1b   :  { %377 = vmatpush.bf16.msra.mxu1 %v725_v33  ;;  %v690_v51 = vld [vmem:[#allocation5 + $0x70] sm:$0xf0]  ;;  %v696_v52 = vld [vmem:[#allocation5 + $0x68] sm:$0xf]  ;;  %v789_v53 = vld [vmem:[#allocation5 + $0x74] sm:$0xf0]  ;;  %v689_v56 = vor.u32 %v788_v48, %v688_v47 }
  0x1c   :  { %426 = vmatpush.bf16.msra.mxu2 %v729_v34  ;;  %475 = vmatpush.bf16.msra.mxu3 %v733_v38  ;;  %v787_v54 = vld [vmem:[#allocation5 + $0x6c] sm:$0xf]  ;;  %v698_v55 = vld [vmem:[#allocation5 + $0x78] sm:$0xf0]  ;;  %v693_v57 = vor.u32 %v786_v49, %v690_v51  ;;  %v697_v58 = vor.u32 %v789_v53, %v696_v52  ;;  %v672_v59 = vld [vmem:[#allocation5 + $0x40] sm:$0xf] }
  0x1d   :  { %v784_v60 = vld [vmem:[#allocation5 + $0x4c] sm:$0xf0]  ;;  %v782_v61 = vld [vmem:[#allocation5 + $0x44] sm:$0xf]  ;;  %v701_v62 = vor.u32 %v787_v54, %v698_v55  ;;  %v674_v63 = vld [vmem:[#allocation5 + $0x50] sm:$0xf0] }
  0x1e   :  { %329 = vmatpush.bf16.msra.mxu0 %v705_v44  ;;  %v680_v0 = vld [vmem:[#allocation5 + $0x48] sm:$0xf]  ;;  %v785_v1 = vld [vmem:[#allocation5 + $0x54] sm:$0xf0]  ;;  %v783_v2 = vld [vmem:[#allocation5 + $0x4c] sm:$0xf]  ;;  %v673_v4 = vor.u32 %v784_v60, %v672_v59  ;;  %v677_v5 = vor.u32 %v782_v61, %v674_v63 }
  0x1f   :  { %378 = vmatpush.bf16.msra.mxu1 %v709_v45  ;;  %v682_v3 = vld [vmem:[#allocation5 + $0x58] sm:$0xf0]  ;;  %v681_v6 = vor.u32 %v785_v1, %v680_v0  ;;  %v656_v7 = vld [vmem:[#allocation5 + $0x20] sm:$0xf]  ;;  %v780_v8 = vld [vmem:[#allocation5 + $0x2c] sm:$0xf0] }
  0x20   :  { %427 = vmatpush.bf16.msra.mxu2 %v713_v46  ;;  %476 = vmatpush.bf16.msra.mxu3 %v717_v50  ;;  %v778_v9 = vld [vmem:[#allocation5 + $0x24] sm:$0xf]  ;;  %v685_v10 = vor.u32 %v783_v2, %v682_v3  ;;  %v658_v11 = vld [vmem:[#allocation5 + $0x30] sm:$0xf0]  ;;  %v664_v12 = vld [vmem:[#allocation5 + $0x28] sm:$0xf]  ;;  %v657_v16 = vor.u32 %v780_v8, %v656_v7 }
  0x21   :  { %v781_v13 = vld [vmem:[#allocation5 + $0x34] sm:$0xf0]  ;;  %v779_v14 = vld [vmem:[#allocation5 + $0x2c] sm:$0xf]  ;;  %v666_v15 = vld [vmem:[#allocation5 + $0x38] sm:$0xf0]  ;;  %v661_v17 = vor.u32 %v778_v9, %v658_v11 }
  0x22   :  { %330 = vmatpush.bf16.msra.mxu0 %v689_v56  ;;  %v665_v18 = vor.u32 %v781_v13, %v664_v12  ;;  %v640_v19 = vld [vmem:[#allocation5] sm:$0xf]  ;;  %v776_v20 = vld [vmem:[#allocation5 + $0xc] sm:$0xf0]  ;;  %v774_v21 = vld [vmem:[#allocation5 + $0x4] sm:$0xf]  ;;  %v669_v22 = vor.u32 %v779_v14, %v666_v15 }
  0x23   :  { %379 = vmatpush.bf16.msra.mxu1 %v693_v57  ;;  %v642_v23 = vld [vmem:[#allocation5 + $0x10] sm:$0xf0]  ;;  %v648_v24 = vld [vmem:[#allocation5 + $0x8] sm:$0xf]  ;;  %v777_v25 = vld [vmem:[#allocation5 + $0x14] sm:$0xf0]  ;;  %v641_v28 = vor.u32 %v776_v20, %v640_v19 }
  0x24   :  { %428 = vmatpush.bf16.msra.mxu2 %v697_v58  ;;  %477 = vmatpush.bf16.msra.mxu3 %v701_v62  ;;  %v775_v26 = vld [vmem:[#allocation5 + $0xc] sm:$0xf]  ;;  %v650_v27 = vld [vmem:[#allocation5 + $0x18] sm:$0xf0]  ;;  %v645_v29 = vor.u32 %v774_v21, %v642_v23  ;;  %v649_v30 = vor.u32 %v777_v25, %v648_v24  ;;  %v766_v32 = vld [vmem:[#allocation2] sm:$0xff]  ;;  %s925_s0 = smov [#allocation8]  }
  0x25   :  { %v653_v31 = vor.u32 %v775_v26, %v650_v27  ;;  %v767_v33 = vld [vmem:[#allocation2 + $0x8] sm:$0xff]  ;;  %v768_v34 = vld [vmem:[#allocation2 + $0x10] sm:$0xff]  ;;  %v769_v35 = vld [vmem:[#allocation2 + $0x18] sm:$0xff]  ;;  %s590_s2 = sshll.u32 %s925_s0, 4  ;;  %s592_s5 = sshll.u32 %s1035_s3, 4  ;;  %s591_s2 = int_to_ptr.vmem [resolvable:$true] %s590_s2  ;;  %s593_s5 = int_to_ptr.hbm [resolvable:$true] %s592_s5 }
  0x26   :  { %331 = vmatpush.bf16.msra.mxu0 %v673_v4  ;;  %v770_v36 = vld [vmem:[#allocation2 + $0x20] sm:$0xff]  ;;  %v771_v37 = vld [vmem:[#allocation2 + $0x28] sm:$0xff]  ;;  %v772_v38 = vld [vmem:[#allocation2 + $0x30] sm:$0xff]  ;;  %s926_s6 = smov 512   ;;  %s927_s7 = smov 32  }
  0x27   :  { %380 = vmatpush.bf16.msra.mxu1 %v677_v5  ;;  %v773_v39 = vld [vmem:[#allocation2 + $0x38] sm:$0xff]  ;;  %v108_v40 = vld [vmem:[#allocation7] sm:$0xf] }
  0x28   :  { %429 = vmatpush.bf16.msra.mxu2 %v681_v6  ;;  %478 = vmatpush.bf16.msra.mxu3 %v685_v10  ;;  %v957_v41 = vperm.slane %v108_v40, 0  ;;  %v959_v42 = vperm.slane %v108_v40, 1  ;;  %v963_v47 = vperm.slane %v108_v40, 2  ;;  %v965_v48 = vperm.slane %v108_v40, 3 }
  0x2a   :  { %332 = vmatpush.bf16.msra.mxu0 %v657_v16 }
  0x2b   :  { %381 = vmatpush.bf16.msra.mxu1 %v661_v17 }
  0x2c   :  { %430 = vmatpush.bf16.msra.mxu2 %v665_v18  ;;  %479 = vmatpush.bf16.msra.mxu3 %v669_v22 }
  0x2e   :  { %333 = vmatpush.bf16.msra.mxu0 %v641_v28 }
  0x2f   :  { %382 = vmatpush.bf16.msra.mxu1 %v645_v29 }
  0x30   :  { %431 = vmatpush.bf16.msra.mxu2 %v649_v30  ;;  %480 = vmatpush.bf16.msra.mxu3 %v653_v31 }
  0x31   :  { %334 = vmatmul.bf16.vlgmr.msra.gmra.mxu0 %v766_v32 }
  0x32   :  { %383 = vmatmul.bf16.vlgmr.msra.gmra.mxu1 %v766_v32 }
  0x33   :  { %432 = vmatmul.bf16.vlgmr.msra.gmra.mxu2 %v766_v32  ;;  %481 = vmatmul.bf16.vlgmr.msra.gmra.mxu3 %v766_v32 }
  0x41   :  { %339 = vmatmul.bf16.gmra.mxu0 %v767_v33 }
  0x42   :  { %388 = vmatmul.bf16.gmra.mxu1 %v767_v33 }
  0x43   :  { %437 = vmatmul.bf16.gmra.mxu2 %v767_v33  ;;  %486 = vmatmul.bf16.gmra.mxu3 %v767_v33 }
  0x51   :  { %344 = vmatmul.bf16.gmra.mxu0 %v768_v34 }
  0x52   :  { %393 = vmatmul.bf16.gmra.mxu1 %v768_v34 }
  0x53   :  { %442 = vmatmul.bf16.gmra.mxu2 %v768_v34  ;;  %491 = vmatmul.bf16.gmra.mxu3 %v768_v34 }
  0x61   :  { %349 = vmatmul.bf16.gmra.mxu0 %v769_v35 }
  0x62   :  { %398 = vmatmul.bf16.gmra.mxu1 %v769_v35 }
  0x63   :  { %447 = vmatmul.bf16.gmra.mxu2 %v769_v35  ;;  %496 = vmatmul.bf16.gmra.mxu3 %v769_v35 }
  0x71   :  { %354 = vmatmul.bf16.gmra.mxu0 %v770_v36 }
  0x72   :  { %403 = vmatmul.bf16.gmra.mxu1 %v770_v36 }
  0x73   :  { %452 = vmatmul.bf16.gmra.mxu2 %v770_v36  ;;  %501 = vmatmul.bf16.gmra.mxu3 %v770_v36 }
  0x81   :  { %359 = vmatmul.bf16.gmra.mxu0 %v771_v37 }
  0x82   :  { %408 = vmatmul.bf16.gmra.mxu1 %v771_v37 }
  0x83   :  { %457 = vmatmul.bf16.gmra.mxu2 %v771_v37  ;;  %506 = vmatmul.bf16.gmra.mxu3 %v771_v37 }
  0x91   :  { %364 = vmatmul.bf16.gmra.mxu0 %v772_v38 }
  0x92   :  { %413 = vmatmul.bf16.gmra.mxu1 %v772_v38 }
  0x93   :  { %462 = vmatmul.bf16.gmra.mxu2 %v772_v38  ;;  %511 = vmatmul.bf16.gmra.mxu3 %v772_v38 }
  0xa1   :  { %369 = vmatmul.bf16.gmra.mxu0 %v773_v39 }
  0xa2   :  { %418 = vmatmul.bf16.gmra.mxu1 %v773_v39 }
  0xa3   :  { %467 = vmatmul.bf16.gmra.mxu2 %v773_v39  ;;  %516 = vmatmul.bf16.gmra.mxu3 %v773_v39 }
  0xae   :  { %v335_v43 = vpop.f32.mrf.mxu0 }
  0xaf   :  { %v336_v44 = vadd.f32 %v335_v43, %v957_v41  ;;  %v384_v45 = vpop.f32.mrf.mxu1 }
  0xb0   :  { %v385_v46 = vadd.f32 %v384_v45, %v959_v42 }
  0xb1   :  { %522 = vst [vmem:[#allocation8] sm:$0xff] %v336_v44 }
  0xb2   :  { %523 = vst [vmem:[#allocation8 + $0x8] sm:$0xff] %v385_v46 }
  0xb6   :  { %v433_v49 = vpop.f32.mrf.mxu2  ;;  %v482_v51 = vpop.f32.mrf.mxu3 }
  0xb7   :  { %v434_v50 = vadd.f32 %v433_v49, %v963_v47  ;;  %v337_v52 = vpop.f32.mrf.mxu0  ;;  %v483_v53 = vadd.f32 %v482_v51, %v965_v48  ;;  %v386_v55 = vpop.f32.mrf.mxu1 }
  0xb8   :  { %v338_v54 = vadd.f32 %v337_v52, %v957_v41  ;;  %v387_v56 = vadd.f32 %v386_v55, %v959_v42 }
  0xb9   :  { %524 = vst [vmem:[#allocation8 + $0x10] sm:$0xff] %v434_v50 }
  0xba   :  { %525 = vst [vmem:[#allocation8 + $0x18] sm:$0xff] %v483_v53 }
  0xbb   :  { %526 = vst [vmem:[#allocation8 + $0x20] sm:$0xff] %v338_v54 }
  0xbc   :  { %527 = vst [vmem:[#allocation8 + $0x28] sm:$0xff] %v387_v56 }
  0xbe   :  { %v435_v57 = vpop.f32.mrf.mxu2  ;;  %v484_v59 = vpop.f32.mrf.mxu3 }
  0xbf   :  { %v436_v58 = vadd.f32 %v435_v57, %v963_v47  ;;  %v340_v60 = vpop.f32.mrf.mxu0  ;;  %v485_v61 = vadd.f32 %v484_v59, %v965_v48  ;;  %v389_v63 = vpop.f32.mrf.mxu1 }
  0xc0   :  { %v341_v62 = vadd.f32 %v340_v60, %v957_v41  ;;  %v390_v0 = vadd.f32 %v389_v63, %v959_v42 }
  0xc1   :  { %528 = vst [vmem:[#allocation8 + $0x30] sm:$0xff] %v436_v58 }
  0xc2   :  { %529 = vst [vmem:[#allocation8 + $0x38] sm:$0xff] %v485_v61 }
  0xc3   :  { %530 = vst [vmem:[#allocation8 + $0x40] sm:$0xff] %v341_v62 }
  0xc4   :  { %531 = vst [vmem:[#allocation8 + $0x48] sm:$0xff] %v390_v0 }
  0xc6   :  { %v438_v1 = vpop.f32.mrf.mxu2  ;;  %v487_v3 = vpop.f32.mrf.mxu3 }
  0xc7   :  { %v439_v2 = vadd.f32 %v438_v1, %v963_v47  ;;  %v342_v4 = vpop.f32.mrf.mxu0  ;;  %v488_v5 = vadd.f32 %v487_v3, %v965_v48  ;;  %v391_v7 = vpop.f32.mrf.mxu1 }
  0xc8   :  { %v343_v6 = vadd.f32 %v342_v4, %v957_v41  ;;  %v392_v8 = vadd.f32 %v391_v7, %v959_v42 }
  0xc9   :  { %532 = vst [vmem:[#allocation8 + $0x50] sm:$0xff] %v439_v2 }
  0xca   :  { %533 = vst [vmem:[#allocation8 + $0x58] sm:$0xff] %v488_v5 }
  0xcb   :  { %534 = vst [vmem:[#allocation8 + $0x60] sm:$0xff] %v343_v6 }
  0xcc   :  { %535 = vst [vmem:[#allocation8 + $0x68] sm:$0xff] %v392_v8 }
  0xce   :  { %v440_v9 = vpop.f32.mrf.mxu2  ;;  %v489_v11 = vpop.f32.mrf.mxu3 }
  0xcf   :  { %v441_v10 = vadd.f32 %v440_v9, %v963_v47  ;;  %v345_v12 = vpop.f32.mrf.mxu0  ;;  %v490_v13 = vadd.f32 %v489_v11, %v965_v48  ;;  %v394_v15 = vpop.f32.mrf.mxu1 }
  0xd0   :  { %v346_v14 = vadd.f32 %v345_v12, %v957_v41  ;;  %v395_v16 = vadd.f32 %v394_v15, %v959_v42 }
  0xd1   :  { %536 = vst [vmem:[#allocation8 + $0x70] sm:$0xff] %v441_v10 }
  0xd2   :  { %537 = vst [vmem:[#allocation8 + $0x78] sm:$0xff] %v490_v13 }
  0xd3   :  { %538 = vst [vmem:[#allocation8 + $0x80] sm:$0xff] %v346_v14 }
  0xd4   :  { %539 = vst [vmem:[#allocation8 + $0x88] sm:$0xff] %v395_v16 }
  0xd6   :  { %v443_v17 = vpop.f32.mrf.mxu2  ;;  %v492_v19 = vpop.f32.mrf.mxu3 }
  0xd7   :  { %v444_v18 = vadd.f32 %v443_v17, %v963_v47  ;;  %v347_v20 = vpop.f32.mrf.mxu0  ;;  %v493_v21 = vadd.f32 %v492_v19, %v965_v48  ;;  %v396_v23 = vpop.f32.mrf.mxu1 }
  0xd8   :  { %v348_v22 = vadd.f32 %v347_v20, %v957_v41  ;;  %v397_v24 = vadd.f32 %v396_v23, %v959_v42 }
  0xd9   :  { %540 = vst [vmem:[#allocation8 + $0x90] sm:$0xff] %v444_v18 }
  0xda   :  { %541 = vst [vmem:[#allocation8 + $0x98] sm:$0xff] %v493_v21 }
  0xdb   :  { %542 = vst [vmem:[#allocation8 + $0xa0] sm:$0xff] %v348_v22 }
  0xdc   :  { %543 = vst [vmem:[#allocation8 + $0xa8] sm:$0xff] %v397_v24 }
  0xde   :  { %v445_v25 = vpop.f32.mrf.mxu2  ;;  %v494_v27 = vpop.f32.mrf.mxu3 }
  0xdf   :  { %v446_v26 = vadd.f32 %v445_v25, %v963_v47  ;;  %v350_v28 = vpop.f32.mrf.mxu0  ;;  %v495_v29 = vadd.f32 %v494_v27, %v965_v48  ;;  %v399_v31 = vpop.f32.mrf.mxu1 }
  0xe0   :  { %v351_v30 = vadd.f32 %v350_v28, %v957_v41  ;;  %v400_v32 = vadd.f32 %v399_v31, %v959_v42 }
  0xe1   :  { %544 = vst [vmem:[#allocation8 + $0xb0] sm:$0xff] %v446_v26 }
  0xe2   :  { %545 = vst [vmem:[#allocation8 + $0xb8] sm:$0xff] %v495_v29 }
  0xe3   :  { %546 = vst [vmem:[#allocation8 + $0xc0] sm:$0xff] %v351_v30 }
  0xe4   :  { %547 = vst [vmem:[#allocation8 + $0xc8] sm:$0xff] %v400_v32 }
  0xe6   :  { %v448_v33 = vpop.f32.mrf.mxu2  ;;  %v497_v35 = vpop.f32.mrf.mxu3 }
  0xe7   :  { %v449_v34 = vadd.f32 %v448_v33, %v963_v47  ;;  %v352_v36 = vpop.f32.mrf.mxu0  ;;  %v498_v37 = vadd.f32 %v497_v35, %v965_v48  ;;  %v401_v39 = vpop.f32.mrf.mxu1 }
  0xe8   :  { %v353_v38 = vadd.f32 %v352_v36, %v957_v41  ;;  %v402_v40 = vadd.f32 %v401_v39, %v959_v42 }
  0xe9   :  { %548 = vst [vmem:[#allocation8 + $0xd0] sm:$0xff] %v449_v34 }
  0xea   :  { %549 = vst [vmem:[#allocation8 + $0xd8] sm:$0xff] %v498_v37 }
  0xeb   :  { %550 = vst [vmem:[#allocation8 + $0xe0] sm:$0xff] %v353_v38 }
  0xec   :  { %551 = vst [vmem:[#allocation8 + $0xe8] sm:$0xff] %v402_v40 }
  0xee   :  { %v450_v43 = vpop.f32.mrf.mxu2  ;;  %v499_v45 = vpop.f32.mrf.mxu3 }
  0xef   :  { %v451_v44 = vadd.f32 %v450_v43, %v963_v47  ;;  %v355_v46 = vpop.f32.mrf.mxu0  ;;  %v500_v49 = vadd.f32 %v499_v45, %v965_v48  ;;  %v404_v51 = vpop.f32.mrf.mxu1 }
  0xf0   :  { %v356_v50 = vadd.f32 %v355_v46, %v957_v41  ;;  %v405_v52 = vadd.f32 %v404_v51, %v959_v42 }
  0xf1   :  { %552 = vst [vmem:[#allocation8 + $0xf0] sm:$0xff] %v451_v44 }
  0xf2   :  { %553 = vst [vmem:[#allocation8 + $0xf8] sm:$0xff] %v500_v49 }
  0xf3   :  { %554 = vst [vmem:[#allocation8 + $0x100] sm:$0xff] %v356_v50 }
  0xf4   :  { %555 = vst [vmem:[#allocation8 + $0x108] sm:$0xff] %v405_v52 }
  0xf6   :  { %v453_v53 = vpop.f32.mrf.mxu2  ;;  %v502_v55 = vpop.f32.mrf.mxu3 }
  0xf7   :  { %v454_v54 = vadd.f32 %v453_v53, %v963_v47  ;;  %v357_v56 = vpop.f32.mrf.mxu0  ;;  %v503_v57 = vadd.f32 %v502_v55, %v965_v48  ;;  %v406_v59 = vpop.f32.mrf.mxu1 }
  0xf8   :  { %v358_v58 = vadd.f32 %v357_v56, %v957_v41  ;;  %v407_v60 = vadd.f32 %v406_v59, %v959_v42 }
  0xf9   :  { %556 = vst [vmem:[#allocation8 + $0x110] sm:$0xff] %v454_v54 }
  0xfa   :  { %557 = vst [vmem:[#allocation8 + $0x118] sm:$0xff] %v503_v57 }
  0xfb   :  { %558 = vst [vmem:[#allocation8 + $0x120] sm:$0xff] %v358_v58 }
  0xfc   :  { %559 = vst [vmem:[#allocation8 + $0x128] sm:$0xff] %v407_v60 }
  0xfe   :  { %v455_v61 = vpop.f32.mrf.mxu2  ;;  %v504_v63 = vpop.f32.mrf.mxu3 }
  0xff   :  { %v456_v62 = vadd.f32 %v455_v61, %v963_v47  ;;  %v360_v0 = vpop.f32.mrf.mxu0  ;;  %v505_v1 = vadd.f32 %v504_v63, %v965_v48  ;;  %v409_v3 = vpop.f32.mrf.mxu1 }
 0x100   :  { %v361_v2 = vadd.f32 %v360_v0, %v957_v41  ;;  %v410_v4 = vadd.f32 %v409_v3, %v959_v42 }
 0x101   :  { %560 = vst [vmem:[#allocation8 + $0x130] sm:$0xff] %v456_v62 }
 0x102   :  { %561 = vst [vmem:[#allocation8 + $0x138] sm:$0xff] %v505_v1 }
 0x103   :  { %562 = vst [vmem:[#allocation8 + $0x140] sm:$0xff] %v361_v2 }
 0x104   :  { %563 = vst [vmem:[#allocation8 + $0x148] sm:$0xff] %v410_v4 }
 0x106   :  { %v458_v5 = vpop.f32.mrf.mxu2  ;;  %v507_v7 = vpop.f32.mrf.mxu3 }
 0x107   :  { %v459_v6 = vadd.f32 %v458_v5, %v963_v47  ;;  %v362_v8 = vpop.f32.mrf.mxu0  ;;  %v508_v9 = vadd.f32 %v507_v7, %v965_v48  ;;  %v411_v11 = vpop.f32.mrf.mxu1 }
 0x108   :  { %v363_v10 = vadd.f32 %v362_v8, %v957_v41  ;;  %v412_v12 = vadd.f32 %v411_v11, %v959_v42 }
 0x109   :  { %564 = vst [vmem:[#allocation8 + $0x150] sm:$0xff] %v459_v6 }
 0x10a   :  { %565 = vst [vmem:[#allocation8 + $0x158] sm:$0xff] %v508_v9 }
 0x10b   :  { %566 = vst [vmem:[#allocation8 + $0x160] sm:$0xff] %v363_v10 }
 0x10c   :  { %567 = vst [vmem:[#allocation8 + $0x168] sm:$0xff] %v412_v12 }
 0x10e   :  { %v460_v13 = vpop.f32.mrf.mxu2  ;;  %v509_v15 = vpop.f32.mrf.mxu3 }
 0x10f   :  { %v461_v14 = vadd.f32 %v460_v13, %v963_v47  ;;  %v365_v16 = vpop.f32.mrf.mxu0  ;;  %v510_v17 = vadd.f32 %v509_v15, %v965_v48  ;;  %v414_v19 = vpop.f32.mrf.mxu1 }
 0x110   :  { %v366_v18 = vadd.f32 %v365_v16, %v957_v41  ;;  %v415_v20 = vadd.f32 %v414_v19, %v959_v42 }
 0x111   :  { %568 = vst [vmem:[#allocation8 + $0x170] sm:$0xff] %v461_v14 }
 0x112   :  { %569 = vst [vmem:[#allocation8 + $0x178] sm:$0xff] %v510_v17 }
 0x113   :  { %570 = vst [vmem:[#allocation8 + $0x180] sm:$0xff] %v366_v18 }
 0x114   :  { %571 = vst [vmem:[#allocation8 + $0x188] sm:$0xff] %v415_v20 }
 0x116   :  { %v463_v21 = vpop.f32.mrf.mxu2  ;;  %v512_v23 = vpop.f32.mrf.mxu3 }
 0x117   :  { %v464_v22 = vadd.f32 %v463_v21, %v963_v47  ;;  %v367_v24 = vpop.f32.mrf.mxu0  ;;  %v513_v25 = vadd.f32 %v512_v23, %v965_v48  ;;  %v416_v27 = vpop.f32.mrf.mxu1 }
 0x118   :  { %v368_v26 = vadd.f32 %v367_v24, %v957_v41  ;;  %v417_v28 = vadd.f32 %v416_v27, %v959_v42 }
 0x119   :  { %572 = vst [vmem:[#allocation8 + $0x190] sm:$0xff] %v464_v22 }
 0x11a   :  { %573 = vst [vmem:[#allocation8 + $0x198] sm:$0xff] %v513_v25 }
 0x11b   :  { %574 = vst [vmem:[#allocation8 + $0x1a0] sm:$0xff] %v368_v26 }
 0x11c   :  { %575 = vst [vmem:[#allocation8 + $0x1a8] sm:$0xff] %v417_v28 }
 0x11e   :  { %v465_v29 = vpop.f32.mrf.mxu2  ;;  %v514_v31 = vpop.f32.mrf.mxu3 }
 0x11f   :  { %v466_v30 = vadd.f32 %v465_v29, %v963_v47  ;;  %v370_v32 = vpop.f32.mrf.mxu0  ;;  %v515_v33 = vadd.f32 %v514_v31, %v965_v48  ;;  %v419_v35 = vpop.f32.mrf.mxu1 }
 0x120   :  { %v371_v34 = vadd.f32 %v370_v32, %v957_v41  ;;  %v420_v36 = vadd.f32 %v419_v35, %v959_v42 }
 0x121   :  { %576 = vst [vmem:[#allocation8 + $0x1b0] sm:$0xff] %v466_v30 }
 0x122   :  { %577 = vst [vmem:[#allocation8 + $0x1b8] sm:$0xff] %v515_v33 }
 0x123   :  { %578 = vst [vmem:[#allocation8 + $0x1c0] sm:$0xff] %v371_v34 }
 0x124   :  { %579 = vst [vmem:[#allocation8 + $0x1c8] sm:$0xff] %v420_v36 }
 0x126   :  { %v468_v37 = vpop.f32.mrf.mxu2  ;;  %v517_v39 = vpop.f32.mrf.mxu3 }
 0x127   :  { %v469_v38 = vadd.f32 %v468_v37, %v963_v47  ;;  %v372_v40 = vpop.f32.mrf.mxu0  ;;  %v518_v43 = vadd.f32 %v517_v39, %v965_v48  ;;  %v421_v45 = vpop.f32.mrf.mxu1 }
 0x128   :  { %v373_v44 = vadd.f32 %v372_v40, %v957_v41  ;;  %v422_v46 = vadd.f32 %v421_v45, %v959_v42 }
 0x129   :  { %580 = vst [vmem:[#allocation8 + $0x1d0] sm:$0xff] %v469_v38 }
 0x12a   :  { %581 = vst [vmem:[#allocation8 + $0x1d8] sm:$0xff] %v518_v43 }
 0x12b   :  { %582 = vst [vmem:[#allocation8 + $0x1e0] sm:$0xff] %v373_v44 }
 0x12c   :  { %583 = vst [vmem:[#allocation8 + $0x1e8] sm:$0xff] %v422_v46 }
 0x12e   :  { %v470_v49 = vpop.f32.mrf.mxu2  ;;  %v519_v51 = vpop.f32.mrf.mxu3 }
 0x12f   :  { %v471_v50 = vadd.f32 %v470_v49, %v963_v47  ;;  %v520_v41 = vadd.f32 %v519_v51, %v965_v48 }
 0x131   :  { %584 = vst [vmem:[#allocation8 + $0x1f0] sm:$0xff] %v471_v50 }
 0x132   :  { %585 = vst [vmem:[#allocation8 + $0x1f8] sm:$0xff] %v520_v41 }
 0x133   :  { %598 = dma.vmem_to_hbm [thread:$0]  %s591_s2, 8192, %s593_s5, [#allocation4], %s926_s6, %s926_s6, %s927_s7  }
 0x134   :  { %916 = dma.done.wait [#allocation4], 8192  }
 0x135   :  { %917 = vsyncadd [#allocation4], 4294959104 }
 0x136   :  { %603 = vsyncpa [#allocation3], 1 }
 0x137   :  { %604 = vsyncpa [#allocation6], 1 }
 0x138   :  { %605 = vsyncpa [#allocation4], 1 }

</bundles_post_ra>
